<compile_context>
chip_gen: v5e
topology: v5e:2x2
jax: 0.10.0
libtpu: 0.0.40
codegen_flags: <defaults>
</compile_context>

<pallas_src>
import functools
import math

import jax
import jax.numpy as jnp
from jax.experimental import pallas as pl
from jax.experimental.pallas import tpu as pltpu


def _round_up(x, m):
    return ((x + m - 1) // m) * m


def _domain_gate_kernel(x_ref, city_ref, w_ref, b_ref, o_ref, acc_ref, *,
                        inv_hw, hw_total, hw_tile):
    """Grid = (B, n_hw_tiles); one batch element per `b` step.

    x_ref:    (C, hw_tile)    one spatial chunk (native dtype: f32 or bf16)
    city_ref: (Dc, 1)         city feature column for this batch element (f32)
    w_ref:    (Dn, C + Dc)    full nn.Linear weight (PyTorch layout, f32)
    b_ref:    (Dn, 1)         bias column (f32)
    o_ref:    (Dn, 1)         softmax gate column for this batch element
    acc_ref:  (C, 1)          running raw spatial sum (f32 VMEM scratch)
    """
    hw = pl.program_id(1)

    @pl.when(hw == 0)
    def _():
        acc_ref[...] = jnp.zeros_like(acc_ref)

    xb = x_ref[...].astype(jnp.float32)                       # (C, hw_tile)

    # In-kernel masking of the last partial tile (replaces wrapper-side pad so
    # x is never copied in HBM).  Statically elided when hw_tile divides HW;
    # on non-final steps the threshold >= hw_tile so the mask is a no-op.
    if hw_total % hw_tile != 0:
        start = hw * hw_tile
        lane = jax.lax.broadcasted_iota(jnp.int32, xb.shape, dimension=1)
        xb = jnp.where(lane < (hw_total - start), xb, 0.0)

    # Accumulate raw spatial sums; the 1/(H*W) scale is hoisted to finalize so
    # the streamed loop does nothing but DMA + one lane-reduce per block.
    acc_ref[...] += jnp.sum(xb, axis=-1, keepdims=True)       # (C, 1)

    @pl.when(hw == pl.num_programs(1) - 1)
    def _():
        avg = acc_ref[...] * inv_hw                            # (C, 1)
        feats = jnp.concatenate(
            [avg, city_ref[...].astype(jnp.float32)], axis=0)  # (C + Dc, 1)
        # One fused MXU push: logits = W @ [avg; city] + b   (column form)
        logits = (jnp.dot(w_ref[...], feats,
                          preferred_element_type=jnp.float32)
                  + b_ref[...])                                # (Dn, 1)
        # Numerically stable softmax over the domain axis, EXACT divide.
        m = jnp.max(logits, axis=0, keepdims=True)
        e = jnp.exp(logits - m)
        o_ref[...] = (e / jnp.sum(e, axis=0, keepdims=True)).astype(o_ref.dtype)


def domain_gate_forward(x, city_feature, weight, bias, *, hw_tile=None,
                        target_block_bytes=8 * 1024 * 1024):
    """DomainGate forward pass.

    x:            (B, C, H, W)   NCHW feature map (f32 or bf16)
    city_feature: (B, Dc)
    weight:       (Dn, C + Dc)   nn.Linear weight (PyTorch layout)
    bias:         (Dn,)          nn.Linear bias
    returns:      (B, Dn)        softmax(dim=1) channel attention
    """
    B, C, H, W = x.shape
    Dc = city_feature.shape[1]
    Dn = weight.shape[0]
    assert weight.shape[1] == C + Dc, "gate_channels must equal C + city_dim"

    HW = H * W
    f32 = jnp.float32

    if hw_tile is None:
        # Target ~8 MiB per streamed x block (double-buffered by Pallas);
        # lanes a multiple of 128, no artificial small cap.
        rows = max(_round_up(C, 8), 8)
        itemsize = jnp.dtype(x.dtype).itemsize
        max_lanes = max(128, (target_block_bytes // (rows * itemsize)) // 128 * 128)
        hw_tile = min(max_lanes, _round_up(HW, 128))
    n_hw = -(-HW // hw_tile)   # ceil-div; last tile is masked in-kernel

    # Metadata-only reshape (no pad, no extra HBM copy); stream native dtype.
    x_flat = x.reshape(B, C, HW)

    city_col = city_feature.astype(f32).reshape(B, Dc, 1)
    w = weight.astype(f32)                       # (Dn, C + Dc), used as-is
    b_col = bias.astype(f32).reshape(Dn, 1)

    kernel = functools.partial(_domain_gate_kernel, inv_hw=1.0 / float(HW),
                               hw_total=HW, hw_tile=hw_tile)

    out_col = pl.pallas_call(
        kernel,
        out_shape=jax.ShapeDtypeStruct((B, Dn, 1), f32),
        grid_spec=pltpu.PrefetchScalarGridSpec(
            num_scalar_prefetch=0,
            grid=(B, n_hw),
            in_specs=[
                # x: one (C, hw_tile) spatial chunk of batch element b.
                pl.BlockSpec((None, C, hw_tile), lambda b, s: (b, 0, s)),
                # city feature column of batch element b.
                pl.BlockSpec((None, Dc, 1), lambda b, s: (b, 0, 0)),
                # weight / bias: resident, full blocks.
                pl.BlockSpec((Dn, C + Dc), lambda b, s: (0, 0)),
                pl.BlockSpec((Dn, 1), lambda b, s: (0, 0)),
            ],
            out_specs=pl.BlockSpec((None, Dn, 1), lambda b, s: (b, 0, 0)),
            scratch_shapes=[pltpu.VMEM((C, 1), f32)],
        ),
        compiler_params=pltpu.CompilerParams(
            dimension_semantics=("parallel", "arbitrary"),
            # 2 x 8 MiB double-buffered x blocks + tiny residents; safe under
            # v7x's 64 MiB physical VMEM, comfortable on v5e/v6e.
            vmem_limit_bytes=48 * 1024 * 1024,
        ),
    )(x_flat, city_col, w, b_col)

    return out_col.reshape(B, Dn)


def _init_linear_params(key, in_features, out_features):
    # Deterministic init mimicking nn.Linear default (uniform +/- 1/sqrt(fan_in)).
    kw, kb = jax.random.split(key)
    bound = 1.0 / math.sqrt(in_features)
    w = jax.random.uniform(kw, (out_features, in_features), jnp.float32,
                           minval=-bound, maxval=bound)
    b = jax.random.uniform(kb, (out_features,), jnp.float32,
                           minval=-bound, maxval=bound)
    return w, b


if __name__ == "__main__":
    key = jax.random.PRNGKey(0)
    k_x, k_city, k_params = jax.random.split(key, 3)

    # Small shapes consistent with the module.
    B, C, H, W = 2, 4, 16, 16
    city_dim = 4
    gate_channels = C + city_dim   # Linear input is concat([avg_pool, city_feature])
    domain_dim = 3

    x = jax.random.normal(k_x, (B, C, H, W), jnp.float32)
    city_feature = jax.random.normal(k_city, (B, city_dim), jnp.float32)
    weight, bias = _init_linear_params(k_params, gate_channels, domain_dim)

    out = domain_gate_forward(x, city_feature, weight, bias)
    out = jax.block_until_ready(out)

    # Reference check in plain JAX (same math as the PyTorch forward).
    avg = jnp.mean(x.reshape(B, C, -1), axis=-1)
    feats = jnp.concatenate([avg, city_feature], axis=1)
    logits = feats @ weight.T + bias
    ref = jax.nn.softmax(logits, axis=1)

    assert out.shape == (B, domain_dim)
    assert jnp.allclose(out, ref, atol=1e-5, rtol=1e-5)
    # Softmax rows sum to 1 (exact divide in the epilogue).
    assert jnp.allclose(jnp.sum(out, axis=1), jnp.ones((B,)), atol=1e-5)

    print("KERNEL_OK")
</pallas_src>

<mosaic_0001>
module attributes {stable_mosaic.version = 11 : i64} {
  func.func @_domain_gate_kernel(%arg0: i32, %arg1: i32, %arg2: memref<1x4x256xf32, #tpu.memory_space<vmem>>, %arg3: memref<1x4x1xf32, #tpu.memory_space<vmem>>, %arg4: memref<3x8xf32, #tpu.memory_space<vmem>>, %arg5: memref<3x1xf32, #tpu.memory_space<vmem>>, %arg6: memref<1x3x1xf32, #tpu.memory_space<vmem>>, %arg7: memref<4x1xf32, #tpu.memory_space<vmem>>) attributes {dimension_semantics = [#tpu.dimension_semantics<parallel>, #tpu.dimension_semantics<arbitrary>], iteration_bounds = array<i64: 2, 1>, scalar_prefetch = 0 : i64, scratch_operands = 1 : i64, tpu.core_type = #tpu.core_type<tc>, window_params = [{transform_indices = @transform_0, window_bounds = array<i64: 1, 4, 256>}, {transform_indices = @transform_1, window_bounds = array<i64: 1, 4, 1>}, {pipeline_mode = #tpu.pipeline_mode<synchronous>, transform_indices = @transform_2, window_bounds = array<i64: 3, 8>}, {pipeline_mode = #tpu.pipeline_mode<synchronous>, transform_indices = @transform_3, window_bounds = array<i64: 3, 1>}, {transform_indices = @transform_4, window_bounds = array<i64: 1, 3, 1>}]} {
    %c0_i32 = arith.constant 0 : i32
    %0 = arith.cmpi eq, %arg1, %c0_i32 : i32
    %1 = arith.extui %0 : i1 to i32
    %c0_i32_0 = arith.constant 0 : i32
    %2 = arith.cmpi ne, %1, %c0_i32_0 : i32
    scf.if %2 {
      %cst_9 = arith.constant 0.000000e+00 : f32
      %13 = vector.broadcast %cst_9 : f32 to vector<4x1xf32>
      %c0_10 = arith.constant 0 : index
      %c0_11 = arith.constant 0 : index
      %14 = vector.load %arg7[%c0_10, %c0_11] : memref<4x1xf32, #tpu.memory_space<vmem>>, vector<4x1xf32>
      tpu.vector_store %arg7[%c0_10, %c0_11], %13 {strides = array<i32>} : memref<4x1xf32, #tpu.memory_space<vmem>>, vector<4x1xf32>,
    } else {
    }
    %c0 = arith.constant 0 : index
    %c0_1 = arith.constant 0 : index
    %c0_2 = arith.constant 0 : index
    %3 = vector.load %arg2[%c0, %c0_1, %c0_2] : memref<1x4x256xf32, #tpu.memory_space<vmem>>, vector<1x4x256xf32>
    %4 = vector.shape_cast %3 : vector<1x4x256xf32> to vector<4x256xf32>
    %c0_3 = arith.constant 0 : index
    %c0_4 = arith.constant 0 : index
    %5 = vector.load %arg7[%c0_3, %c0_4] : memref<4x1xf32, #tpu.memory_space<vmem>>, vector<4x1xf32>
    %cst = arith.constant dense<0.000000e+00> : vector<4xf32>
    %6 = vector.multi_reduction <add>, %4, %cst [1] : vector<4x256xf32> to vector<4xf32>
    %7 = vector.shape_cast %6 : vector<4xf32> to vector<4x1xf32>
    %8 = arith.addf %5, %7 : vector<4x1xf32>
    %c0_5 = arith.constant 0 : index
    %c0_6 = arith.constant 0 : index
    %9 = vector.load %arg7[%c0_5, %c0_6] : memref<4x1xf32, #tpu.memory_space<vmem>>, vector<4x1xf32>
    tpu.vector_store %arg7[%c0_5, %c0_6], %8 {strides = array<i32>} : memref<4x1xf32, #tpu.memory_space<vmem>>, vector<4x1xf32>,
    %c0_i32_7 = arith.constant 0 : i32
    %10 = arith.cmpi eq, %arg1, %c0_i32_7 : i32
    %11 = arith.extui %10 : i1 to i32
    %c0_i32_8 = arith.constant 0 : i32
    %12 = arith.cmpi ne, %11, %c0_i32_8 : i32
    scf.if %12 {
      %c0_9 = arith.constant 0 : index
      %c0_10 = arith.constant 0 : index
      %13 = vector.load %arg7[%c0_9, %c0_10] : memref<4x1xf32, #tpu.memory_space<vmem>>, vector<4x1xf32>
      %cst_11 = arith.constant 3.906250e-03 : f32
      %14 = vector.broadcast %cst_11 : f32 to vector<4x1xf32>
      %15 = arith.mulf %13, %14 : vector<4x1xf32>
      %c0_12 = arith.constant 0 : index
      %c0_13 = arith.constant 0 : index
      %c0_14 = arith.constant 0 : index
      %16 = vector.load %arg3[%c0_12, %c0_13, %c0_14] : memref<1x4x1xf32, #tpu.memory_space<vmem>>, vector<1x4x1xf32>
      %17 = vector.shape_cast %16 : vector<1x4x1xf32> to vector<4x1xf32>
      %18 = tpu.concatenate %15, %17 in 0 : vector<4x1xf32>, vector<4x1xf32> -> vector<8x1xf32>
      %c0_15 = arith.constant 0 : index
      %c0_16 = arith.constant 0 : index
      %19 = vector.load %arg4[%c0_15, %c0_16] : memref<3x8xf32, #tpu.memory_space<vmem>>, vector<3x8xf32>
      %cst_17 = arith.constant dense<0.000000e+00> : vector<3x1xf32>
      %20 = tpu.matmul %19, %18, %cst_17 {dimension_numbers = #tpu.dot_dimension_numbers<[1], [0], [0], [1], [0, 0, 1, 1], [], []>} : vector<3x8xf32>, vector<8x1xf32>, vector<3x1xf32> -> vector<3x1xf32>
      %c0_18 = arith.constant 0 : index
      %c0_19 = arith.constant 0 : index
      %21 = vector.load %arg5[%c0_18, %c0_19] : memref<3x1xf32, #tpu.memory_space<vmem>>, vector<3x1xf32>
      %22 = arith.addf %20, %21 : vector<3x1xf32>
      %cst_20 = arith.constant dense<0xFF800000> : vector<1xf32>
      %23 = vector.multi_reduction <maximumf>, %22, %cst_20 [0] : vector<3x1xf32> to vector<1xf32>
      %24 = vector.shape_cast %23 : vector<1xf32> to vector<1x1xf32>
      %25 = vector.broadcast %24 : vector<1x1xf32> to vector<3x1xf32>
      %26 = arith.subf %22, %25 : vector<3x1xf32>
      %27 = math.exp %26 : vector<3x1xf32>
      %cst_21 = arith.constant dense<0.000000e+00> : vector<1xf32>
      %28 = vector.multi_reduction <add>, %27, %cst_21 [0] : vector<3x1xf32> to vector<1xf32>
      %29 = vector.shape_cast %28 : vector<1xf32> to vector<1x1xf32>
      %30 = vector.broadcast %29 : vector<1x1xf32> to vector<3x1xf32>
      %31 = arith.divf %27, %30 : vector<3x1xf32>
      %c0_22 = arith.constant 0 : index
      %c0_23 = arith.constant 0 : index
      %c0_24 = arith.constant 0 : index
      %32 = vector.load %arg6[%c0_22, %c0_23, %c0_24] : memref<1x3x1xf32, #tpu.memory_space<vmem>>, vector<1x3x1xf32>
      %33 = vector.shape_cast %32 : vector<1x3x1xf32> to vector<3x1xf32>
      %34 = vector.shape_cast %31 : vector<3x1xf32> to vector<1x3x1xf32>
      tpu.vector_store %arg6[%c0_22, %c0_23, %c0_24], %34 {strides = array<i32>} : memref<1x3x1xf32, #tpu.memory_space<vmem>>, vector<1x3x1xf32>,
    } else {
    }
    return
  }
  func.func @transform_0(%arg0: i32, %arg1: i32) -> (i32, i32, i32) {
    %c0_i32 = arith.constant 0 : i32
    %c0_i32_0 = arith.constant 0 : i32
    return %arg0, %c0_i32, %arg1 : i32, i32, i32
  }
  func.func @transform_1(%arg0: i32, %arg1: i32) -> (i32, i32, i32) {
    %c0_i32 = arith.constant 0 : i32
    %c0_i32_0 = arith.constant 0 : i32
    %c0_i32_1 = arith.constant 0 : i32
    return %arg0, %c0_i32, %c0_i32_0 : i32, i32, i32
  }
  func.func @transform_2(%arg0: i32, %arg1: i32) -> (i32, i32) {
    %c0_i32 = arith.constant 0 : i32
    %c0_i32_0 = arith.constant 0 : i32
    %c0_i32_1 = arith.constant 0 : i32
    return %c0_i32, %c0_i32_0 : i32, i32
  }
  func.func @transform_3(%arg0: i32, %arg1: i32) -> (i32, i32) {
    %c0_i32 = arith.constant 0 : i32
    %c0_i32_0 = arith.constant 0 : i32
    %c0_i32_1 = arith.constant 0 : i32
    return %c0_i32, %c0_i32_0 : i32, i32
  }
  func.func @transform_4(%arg0: i32, %arg1: i32) -> (i32, i32, i32) {
    %c0_i32 = arith.constant 0 : i32
    %c0_i32_0 = arith.constant 0 : i32
    %c0_i32_1 = arith.constant 0 : i32
    return %arg0, %c0_i32, %c0_i32_0 : i32, i32, i32
  }
}

</mosaic_0001>

<bundles_post_ra>
// kernel: tpu_custom_call.1
= control target key start
LH: loop header
LB: loop body
LE: loop exit
PB: predicated region body
PF: predicated region fallthrough
CT: control target
= control target key end

     0   :  { %9 = vsyncpa [#allocation4], 0  ;;  %s726_s0 = inlined_call_operand.hbm [shape: f32[2,4,256], index: 0, kind: input, shape index: {}]   ;;  %s727_s1 = inlined_call_operand.vmem [shape: f32[2,4,1], index: 1, kind: input, shape index: {}]   ;;  %s728_s2 = inlined_call_operand.vmem [shape: f32[3,8], index: 2, kind: input, shape index: {}]   ;;  %s729_s3 = inlined_call_operand.vmem [shape: f32[3,1], index: 3, kind: input, shape index: {}]   ;;  %s730_s4 = inlined_call_operand.vmem [shape: f32[2,3,1], index: 4, kind: output, shape index: {}]  }
   0x1   :  { %11 = vsyncpa [#allocation4 + $0x1], 0  ;;  %s614_s15 = smov 0   ;;  %s616_s16 = smov 0  }
   0x2   :  { %s618_s17 = smov 0   ;;  %s620_s18 = smov 0  }
   0x3   :  { %s622_s19 = smov 0   ;;  %s624_s20 = smov 0  }
   0x4 LB: > { %s431_s21 = sadd.s32 4294967295, %s586_s20   ;;  %s29_s22 = sadd.s32 1, %s582_s19  ;;  %s586_s20 = sphi %s624_s20, %s17_s20   ;;  %s582_s19 = sphi %s622_s19, %s737_s19   ;;  %s578_s18 = sphi %s620_s18, %s736_s18   ;;  %s574_s17 = sphi %s618_s17, %s735_s17   ;;  %s570_s16 = sphi %s616_s16, %s734_s16   ;;  %s566_s15 = sphi %s614_s15, %s733_s15  }
   0x5   : > { %p31_p0 = scmp.ge.s32.totalorder %s29_s22, 2  ;;  %s38_s23 = sadd.s32 1, %s574_s17 }
   0x6   : > { %p45_p1 = scmp.ne.s32.totalorder %s574_s17, %s570_s16  ;;  %p46_p2 = scmp.eq.s32.totalorder %s586_s20, 0 }
   0x7   : > { %s739_s22 = smov (%p31_p0, %s29_s22), 0  ;;  %p51_p4 = scmp.ne.s32.totalorder %s570_s16, %s566_s15 }
   0x8   : > { %p650_p3 = por %p46_p2, %p45_p1  ;;  %s33_s25 = ssub.s32 %s582_s19, %s739_s22 }
   0x9   : > { %p52_p5 = scmp.eq.s32.totalorder %s431_s21, 0  ;;  %p36_p6 = scmp.eq.s32.totalorder %s33_s25, 0 }
   0xa   : > { %p452_p8 = scmp.lt.s32.totalorder %s586_s20, 2  ;;  %s175_s28 = sand.u32 1, %s574_s17  }
   0xb   : > { %p657_p7 = por %p52_p5, %p51_p4  ;;  %s445_s29 = sshll.u32 %s582_s19, 3 }
   0xc   : > { %s663_s27 = scalar_select %p36_p6, %s574_s17, %s38_s23  }
   0xd   : > { %s435_s30 = sshll.u32 %s175_s28, 3  ;;  %s186_s7 = scalar_lea.hbm %s726_s0, %s445_s29 }
   0xe   : > { %s188_s8 = sshll.u32 %s186_s7, 4  ;;  %s179_s9 = scalar_lea.vmem [#allocation3], %s435_s30  ;;  %s189_s8 = int_to_ptr.hbm [resolvable:$true] %s188_s8 }
   0xf   : > { %s190_s10 = sshll.u32 %s179_s9, 4  ;;  %p449_p9 = pnand %p452_p8, %p650_p3  ;;  %s191_s10 = int_to_ptr.vmem [resolvable:$true] %s190_s10 }
  0x10   : > { %p438_p10 = scmp.ge.s32.totalorder %s586_s20, 1  ;;  %p202_p11 = scmp.lt.s32.totalorder %s586_s20, 3 }
  0x11   : > { %s176_s11 = scalar_lea.sflag [#allocation4], %s175_s28 }
  0x12   : > { %451 = dma.hbm_to_vmem [thread:$0]  (!%p449_p9), %s189_s8, 128, %s191_s10, %s176_s11  }
  0x13   : > { %p203_p12 = pnand %p438_p10, %p202_p11 }
  0x14   : > { %s208_s12 = sand.u32 (!%p203_p12), 1, %s570_s16  }
  0x15   : > { %206 = sbr.rel (%p203_p12) target bundleno = 355 (0x163), region = 36  ;;  %s439_s13 = sshll.u32 (!%p203_p12), %s208_s12, 3 }
  0x16   : > { %s209_s14 = scalar_lea.sflag (!%p203_p12), [#allocation4], %s208_s12  ;;  %s212_s15 = scalar_lea.vmem (!%p203_p12), [#allocation3], %s439_s13 }
  0x1a   : > { %561 = dma.done.wait (%p657_p7), %s209_s14, 128  }
  0x1b   : > { %563 = vsyncadd (%p657_p7), %s209_s14, 4294967168  ;;  %vm254_vm0 = vcmask 3072   ;;  %v588_v0 = vmov 0.0   ;;  %v256_v1 = vld [vmem:[%s212_s15] sm:$0xff]  ;;  %vm264_vm1 = vcmask 1043456   ;;  %p242_p13 = scmp.lt.s32.totalorder %s578_s18, 1 }
  0x1c   : > { %255 = vst.msk [vmem:[#allocation2] sm:$0xf] %vm254_vm0, %v588_v0  ;;  %v283_v14 = vld [vmem:[%s728_s2] sm:$0x7]  ;;  %vm285_vm2 = vcmask 64512   ;;  %vm309_vm3 = vcmask 2048  }
  0x1d   : > { %259 = vst [vmem:[#allocation1] ss:$2 sm:$0xff] %v256_v1  ;;  %s741_s18 = smov (!%p242_p13, %s578_s18), 1  ;;  %v284_v16 = vld [vmem:[%s729_s3] sm:$0x7] }
  0x1e   : > { %s440_s21 = sshll.u32 %s741_s18, 2 }
  0x1f   : > { %s245_s25 = scalar_lea.vmem %s727_s1, %s440_s21  ;;  %s249_s7 = scalar_lea.vmem %s730_s4, %s440_s21 }
  0x20   : > { %v278_v10 = vld [vmem:[%s245_s25] sm:$0xf] }
  0x21   : > { %v280_v11 = vrot.slane %v278_v10, 4 }
  0x23   : > { %v257_v7 = vld [vmem:[#allocation2] sm:$0xf] }
  0x24   : > { %v260_v2 = vld.sshfl [vmem:[#allocation1] sm:$0xff pattern:$0x75316420]  ;;  %v261_v3 = vld.sshfl [vmem:[#allocation1 + $0x8] sm:$0xff pattern:$0x75316420] }
  0x25   : > { %v265_v4 = vsel %vm264_vm1, %v260_v2, 0.0  ;;  %v266_v5 = vsel %vm264_vm1, %v261_v3, 0.0 }
  0x26   : > { %v267_v6 = vadd.f32 %v266_v5, %v265_v4 }
  0x28   : > { %268 = vadd.xlane.f32.xlu0 %v267_v6 }
  0x9b   : > { %v269_v8 = vpop.xlane.xlu0 %268 }
  0x9c   : > { %v270_v9 = vadd.f32 %v269_v8, %v257_v7 }
  0x9e   : > { %272 = vst.msk [vmem:[#allocation2] sm:$0xf] %vm254_vm0, %v270_v9 }
  0xa5   : > { %v276_v12 = vld [vmem:[#allocation2] sm:$0xf] }
  0xa6   : > { %v277_v13 = vmul.f32 0.00390625, %v276_v12 }
  0xa8   : > { %v282_v15 = vsel %vm264_vm1, %v277_v13, %v280_v11 }
  0xa9   : > { %304 = vmatpush.msra.mxu0 %v282_v15 }
  0xaa   : > { %442 = vmatmul.msk.f32.vlgmr.msra.gmra.mxu0 %vm285_vm2, %v283_v14 }
 0x127   : > { %v306_v17 = vpop.f32.mrf.mxu0 }
 0x128   : > { %v307_v18 = vadd.f32 %v306_v17, %v284_v16 }
 0x12a   : > { %v310_v19 = vsel %vm309_vm3, %v307_v18, -inf }
 0x12b   : > { %v311_v20 = vrot.slane %v310_v19, 4 }
 0x12d   : > { %v312_v21 = vmax.f32 %v310_v19, %v311_v20 }
 0x12f   : > { %v313_v22 = vrot.slane %v312_v21, 2 }
 0x131   : > { %v314_v23 = vmax.f32 %v312_v21, %v313_v22 }
 0x133   : > { %v315_v24 = vrot.slane %v314_v23, 1 }
 0x135   : > { %v316_v25 = vmax.f32 %v314_v23, %v315_v24 }
 0x137   : > { %v317_v26 = vsub.f32 %v307_v18, %v316_v25 }
 0x139   : > { %v318_v27 = vmul.f32 1.442695, %v317_v26 }
 0x13b   : > { %502 = vpow2.f32 %v318_v27 }
 0x141   : > { %v503_v28 = vpop.eup %502 }
 0x142   : > { %v320_v29 = vsel %vm309_vm3, %v503_v28, 0.0 }
 0x143   : > { %v321_v30 = vrot.slane %v320_v29, 4 }
 0x145   : > { %v322_v31 = vadd.f32 %v321_v30, %v320_v29 }
 0x147   : > { %v323_v32 = vrot.slane %v322_v31, 2 }
 0x149   : > { %v324_v33 = vadd.f32 %v323_v32, %v322_v31 }
 0x14b   : > { %v325_v34 = vrot.slane %v324_v33, 1 }
 0x14d   : > { %v326_v35 = vadd.f32 %v325_v34, %v324_v33 }
 0x14f   : > { %504 = vrcp.f32 %v326_v35  ;;  %v338_v39 = vand.u32 2147483648, %v326_v35  ;;  %v336_v41 = vand.u32 2147483647, %v326_v35  ;;  %vm332_vm5 = vweird.f32 %v326_v35 }
 0x151   : > { %v339_v43 = vor.u32 1.1754944e-38, %v338_v39  ;;  %vm337_vm7 = vcmp.eq.f32.partialorder %v336_v41, 8.507059e+37 }
 0x155   : > { %v505_v36 = vpop.eup %504 }
 0x156   : > { %v328_v37 = vmul.f32 %v505_v36, %v326_v35  ;;  %vm333_vm4 = vweird.f32 %v505_v36 }
 0x157   : > { %vm334_vm6 = vmor %vm332_vm5, %vm333_vm4 }
 0x158   : > { %v329_v38 = vsub.f32 1.0, %v328_v37 }
 0x15a   : > { %v330_v40 = vmul.f32 %v505_v36, %v329_v38 }
 0x15c   : > { %v331_v42 = vadd.f32 %v505_v36, %v330_v40 }
 0x15e   : > { %v335_v44 = vsel %vm334_vm6, %v505_v36, %v331_v42 }
 0x15f   : > { %v340_v45 = vsel %vm337_vm7, %v339_v43, %v335_v44 }
 0x160   : > { %v341_v46 = vmul.f32 %v503_v28, %v340_v45 }
 0x162   : > { %342 = vst.msk [vmem:[%s249_s7] sm:$0x7] %vm309_vm3, %v341_v46 }
 0x163 PF: > { %s17_s20 = sadd.s32 1, %s586_s20   ;;  %s733_s15 = smov %s570_s16 }
 0x164   : > { %p14_p0 = scmp.ge.s32.totalorder %s17_s20, 4   ;;  %s734_s16 = smov %s574_s17 }
 0x165   : > { %s735_s17 = smov %s663_s27  ;;  %s736_s18 = smov %s582_s19 }
 0x166   : > { %s737_s19 = smov %s739_s22  ;;  %16 = sbr.rel (!%p14_p0) target bundleno = 4 (0x4), region = 87 }
 0x16b   :  { %362 = vsyncpa [#allocation4], 1 }
 0x16c   :  { %364 = vsyncpa [#allocation4 + $0x1], 1 }

</bundles_post_ra>
